<compile_context>
chip_gen: v7x
topology: tpu7x:2x2x1
jax: 0.10.0
libtpu: 0.0.40
codegen_flags: <defaults>
</compile_context>

<pallas_src>
import jax
import jax.numpy as jnp
import numpy as np
from jax.experimental import pallas as pl
from jax.experimental.pallas import tpu as pltpu

TM = 512  # GEMM / elementwise row tile (MXU + HBM-roofline friendly, fits v5e scoped VMEM)


def _round_up(x, m):
    return (x + m - 1) // m * m


# ----------------------------- Pallas kernels ------------------------------

def _matmul_bn_kernel(a_ref, b_ref, o_ref, sum_ref, sq_ref):
    # Single full-K block: no k-loop, no accumulator scratch.
    acc = jnp.dot(a_ref[...], b_ref[...], preferred_element_type=jnp.float32)
    o_ref[...] = acc
    # Per-tile BN partial statistics (zero-padded rows contribute 0, so they
    # are harmless; the wrapper divides by the true valid row count M).
    sum_ref[...] = jnp.sum(acc, axis=0)[None, None, :]
    sq_ref[...] = jnp.sum(acc * acc, axis=0)[None, None, :]


def _matmul_tanh_kernel(a_ref, b_ref, o_ref):
    acc = jnp.dot(a_ref[...], b_ref[...], preferred_element_type=jnp.float32)
    o_ref[...] = jnp.tanh(acc)  # EUP slot; free under the MXU epilogue


def _matmul_kernel(a_ref, b_ref, o_ref):
    o_ref[...] = jnp.dot(a_ref[...], b_ref[...], preferred_element_type=jnp.float32)


def _bn_relu_kernel(x_ref, mean_ref, invstd_ref, o_ref):
    # per-channel normalize (gamma=1, beta=0) + ReLU, emitted as bf16 for the
    # next layer's GEMM.
    y = (x_ref[...] - mean_ref[...]) * invstd_ref[...]
    o_ref[...] = jnp.maximum(y, 0.0).astype(o_ref.dtype)


# --------------------------- pallas_call wrappers ---------------------------

def _gemm_specs(Kp, Np):
    in_specs = [pl.BlockSpec((TM, Kp), lambda i: (i, 0)),   # A: one M tile, full K
                pl.BlockSpec((Kp, Np), lambda i: (0, 0))]   # B: resident full block
    y_spec = pl.BlockSpec((TM, Np), lambda i: (i, 0))
    return in_specs, y_spec


def pallas_gemm_bn(a, b):
    """y = a @ b plus per-M-tile (sum, sum_sq) over rows, for fused BN stats."""
    Mp, Kp = a.shape
    _, Np = b.shape
    nmt = Mp // TM
    in_specs, y_spec = _gemm_specs(Kp, Np)
    stat_spec = pl.BlockSpec((1, 1, Np), lambda i: (i, 0, 0))
    return pl.pallas_call(
        _matmul_bn_kernel,
        out_shape=(jax.ShapeDtypeStruct((Mp, Np), jnp.float32),
                   jax.ShapeDtypeStruct((nmt, 1, Np), jnp.float32),
                   jax.ShapeDtypeStruct((nmt, 1, Np), jnp.float32)),
        grid_spec=pltpu.PrefetchScalarGridSpec(
            num_scalar_prefetch=0, grid=(nmt,),
            in_specs=in_specs,
            out_specs=(y_spec, stat_spec, stat_spec)),
        compiler_params=pltpu.CompilerParams(
            dimension_semantics=("parallel",)),
    )(a, b)


def pallas_gemm(a, b, act=None):
    """y = a @ b, with optional fused tanh epilogue."""
    Mp, Kp = a.shape
    _, Np = b.shape
    nmt = Mp // TM
    in_specs, y_spec = _gemm_specs(Kp, Np)
    kernel = _matmul_tanh_kernel if act == "tanh" else _matmul_kernel
    return pl.pallas_call(
        kernel,
        out_shape=jax.ShapeDtypeStruct((Mp, Np), jnp.float32),
        grid_spec=pltpu.PrefetchScalarGridSpec(
            num_scalar_prefetch=0, grid=(nmt,),
            in_specs=in_specs, out_specs=y_spec),
        compiler_params=pltpu.CompilerParams(
            dimension_semantics=("parallel",)),
    )(a, b)


def pallas_bn_relu(x, mean, invstd):
    Mp, Np = x.shape
    return pl.pallas_call(
        _bn_relu_kernel,
        out_shape=jax.ShapeDtypeStruct((Mp, Np), jnp.bfloat16),
        grid_spec=pltpu.PrefetchScalarGridSpec(
            num_scalar_prefetch=0, grid=(Mp // TM,),
            in_specs=[pl.BlockSpec((TM, Np), lambda i: (i, 0)),
                      pl.BlockSpec((1, Np), lambda i: (0, 0)),
                      pl.BlockSpec((1, Np), lambda i: (0, 0))],
            out_specs=pl.BlockSpec((TM, Np), lambda i: (i, 0))),
        compiler_params=pltpu.CompilerParams(
            dimension_semantics=("parallel",)),
    )(x, mean, invstd)


# --------------------------- layer-level glue -------------------------------

def deconv2d_layer(x_nhwc, w_t, stride, padding, norm, act):
    """One DECOV2d block.  w_t is PyTorch ConvTranspose2d weight (Cin, Cout, K, K)."""
    Nb, H, W, Cin = x_nhwc.shape
    Cin_w, Cout, K, _ = w_t.shape
    assert Cin == Cin_w

    # bf16 activations on the GEMM path (f32 accumulation inside the kernel).
    x_nhwc = x_nhwc.astype(jnp.bfloat16)

    # ConvTranspose2d == zero-dilate by stride, pad by K-1-padding, conv w/ flipped kernel
    if stride > 1:
        xd = jnp.zeros((Nb, (H - 1) * stride + 1, (W - 1) * stride + 1, Cin),
                       jnp.bfloat16)
        xd = xd.at[:, ::stride, ::stride, :].set(x_nhwc)
    else:
        xd = x_nhwc
    pad = K - 1 - padding
    xp = jnp.pad(xd, ((0, 0), (pad, pad), (pad, pad), (0, 0)))
    Hp, Wp = xp.shape[1], xp.shape[2]
    Ho, Wo = Hp - K + 1, Wp - K + 1

    # im2col (plain-JAX glue): (Nb*Ho*Wo, K*K*Cin)
    # TODO(synk): implicit-GEMM (kernel-side indexing of the padded input) and
    # subpixel/phase decomposition for the stride-2 layers would avoid streaming
    # the 75% structural zeros; kept as materialized im2col here.
    cols = [xp[:, ky:ky + Ho, kx:kx + Wo, :] for ky in range(K) for kx in range(K)]
    patches = jnp.stack(cols, axis=3).reshape(Nb * Ho * Wo, K * K * Cin)

    # weight: flip spatially, (Cin,Cout,K,K) -> (K,K,Cin,Cout) -> (K*K*Cin, Cout)
    w_conv = jnp.flip(w_t, (2, 3)).transpose(2, 3, 0, 1).reshape(K * K * Cin, Cout)
    w_conv = w_conv.astype(jnp.bfloat16)

    # pad operands to tile multiples (single full-K / full-N block per layer;
    # Kp <= ~1.7k and Np = 128 at these channel counts, so B stays VMEM-resident).
    M, Kd = patches.shape
    Mp, Kp, Np = _round_up(M, TM), _round_up(Kd, 128), _round_up(Cout, 128)
    a = jnp.pad(patches, ((0, Mp - M), (0, Kp - Kd)))
    b = jnp.pad(w_conv, ((0, Kp - Kd), (0, Np - Cout)))

    if norm:
        y, psum, psq = pallas_gemm_bn(a, b)
        # Finalize BN batch stats from the tiny per-tile partials (padded rows
        # contributed zeros, so dividing by the true M is exact).
        s = jnp.sum(psum[:, 0, :], axis=0)          # (Np,)
        sq = jnp.sum(psq[:, 0, :], axis=0)          # (Np,)
        mean = s / M
        var = jnp.maximum(sq / M - mean * mean, 0.0)
        invstd = jax.lax.rsqrt(var + 1e-5)
        y = pallas_bn_relu(y, mean.reshape(1, Np), invstd.reshape(1, Np))  # bf16
    else:
        y = pallas_gemm(a, b, act=act)               # tanh fused in epilogue (f32)

    return y[:M, :Cout].reshape(Nb, Ho, Wo, Cout)


_CFGS = [  # (stride, padding, norm, activation)  -- mirrors Generator.__init__
    (1, 0, True, "relu"),
    (2, 1, True, "relu"),
    (2, 1, True, "relu"),
    (2, 1, True, "relu"),
    (2, 1, False, "tanh"),  # last deconv has no norm/relu; tanh applied in forward
]


def generator_forward(x_nchw, params):
    x = jnp.transpose(x_nchw, (0, 2, 3, 1))  # NCHW -> NHWC
    for w, (s, p, norm, act) in zip(params, _CFGS):
        x = deconv2d_layer(x, w, s, p, norm, act)
    return jnp.transpose(x, (0, 3, 1, 2))    # NHWC -> NCHW


# ------------------------------- reference ----------------------------------

def reference_forward(x_nchw, params):
    x = jnp.transpose(x_nchw, (0, 2, 3, 1))
    for w, (s, p, norm, act) in zip(params, _CFGS):
        K = w.shape[2]
        w_conv = jnp.flip(w, (2, 3)).transpose(2, 3, 0, 1)  # HWIO
        x = jax.lax.conv_general_dilated(
            x, w_conv, window_strides=(1, 1),
            padding=[(K - 1 - p, K - 1 - p)] * 2,
            lhs_dilation=(s, s),
            dimension_numbers=("NHWC", "HWIO", "NHWC"),
            precision=jax.lax.Precision.HIGHEST)
        if norm:
            mean = jnp.mean(x, axis=(0, 1, 2))
            var = jnp.var(x, axis=(0, 1, 2))
            x = (x - mean) / jnp.sqrt(var + 1e-5)
            x = jnp.maximum(x, 0.0)
        if act == "tanh":
            x = jnp.tanh(x)
    return jnp.transpose(x, (0, 3, 1, 2))


# --------------------------------- main --------------------------------------

if __name__ == "__main__":
    key = jax.random.PRNGKey(0)
    in_channels, out_channels, nker = 4, 3, 8   # small nker for a quick run
    K = 5
    chans = [in_channels, nker * 8, nker * 4, nker * 2, nker * 1, out_channels]

    # deterministic ConvTranspose2d weights, PyTorch layout (Cin, Cout, K, K), bias=False
    params = []
    for i in range(5):
        key, sub = jax.random.split(key)
        cin, cout = chans[i], chans[i + 1]
        w = jax.random.normal(sub, (cin, cout, K, K), jnp.float32) / jnp.sqrt(cin * K * K)
        params.append(w)

    key, sub = jax.random.split(key)
    x = jax.random.normal(sub, (2, in_channels, 2, 2), jnp.float32)  # NCHW latent

    out = generator_forward(x, params)          # (2, 3, 111, 111) NCHW
    out = jax.block_until_ready(out)

    ref = reference_forward(x, params)
    np.testing.assert_allclose(np.asarray(out), np.asarray(ref), atol=5e-2, rtol=5e-2)
    assert out.shape == (2, out_channels, 111, 111)

    print("KERNEL_OK")
</pallas_src>

<mosaic_0001>
module attributes {stable_mosaic.version = 11 : i64} {
  func.func @_matmul_bn_kernel(%arg0: i32, %arg1: memref<512x128xbf16, #tpu.memory_space<vmem>>, %arg2: memref<128x128xbf16, #tpu.memory_space<vmem>>, %arg3: memref<512x128xf32, #tpu.memory_space<vmem>>, %arg4: memref<1x1x128xf32, #tpu.memory_space<vmem>>, %arg5: memref<1x1x128xf32, #tpu.memory_space<vmem>>) attributes {dimension_semantics = [#tpu.dimension_semantics<parallel>], iteration_bounds = array<i64: 1>, scalar_prefetch = 0 : i64, scratch_operands = 0 : i64, tpu.core_type = #tpu.core_type<tc>, window_params = [{transform_indices = @transform_0, window_bounds = array<i64: 512, 128>}, {pipeline_mode = #tpu.pipeline_mode<synchronous>, transform_indices = @transform_1, window_bounds = array<i64: 128, 128>}, {transform_indices = @transform_2, window_bounds = array<i64: 512, 128>}, {transform_indices = @transform_3, window_bounds = array<i64: 1, 1, 128>}, {transform_indices = @transform_4, window_bounds = array<i64: 1, 1, 128>}]} {
    %c0 = arith.constant 0 : index
    %c0_0 = arith.constant 0 : index
    %0 = vector.load %arg1[%c0, %c0_0] : memref<512x128xbf16, #tpu.memory_space<vmem>>, vector<512x128xbf16>
    %c0_1 = arith.constant 0 : index
    %c0_2 = arith.constant 0 : index
    %1 = vector.load %arg2[%c0_1, %c0_2] : memref<128x128xbf16, #tpu.memory_space<vmem>>, vector<128x128xbf16>
    %cst = arith.constant dense<0.000000e+00> : vector<512x128xf32>
    %2 = tpu.matmul %0, %1, %cst {dimension_numbers = #tpu.dot_dimension_numbers<[1], [0], [0], [1], [0, 0, 1, 1], [], []>} : vector<512x128xbf16>, vector<128x128xbf16>, vector<512x128xf32> -> vector<512x128xf32>
    %c0_3 = arith.constant 0 : index
    %c0_4 = arith.constant 0 : index
    %3 = vector.load %arg3[%c0_3, %c0_4] : memref<512x128xf32, #tpu.memory_space<vmem>>, vector<512x128xf32>
    tpu.vector_store %arg3[%c0_3, %c0_4], %2 {strides = array<i32>} : memref<512x128xf32, #tpu.memory_space<vmem>>, vector<512x128xf32>,
    %cst_5 = arith.constant dense<0.000000e+00> : vector<128xf32>
    %4 = vector.multi_reduction <add>, %2, %cst_5 [0] : vector<512x128xf32> to vector<128xf32>
    %5 = vector.shape_cast %4 : vector<128xf32> to vector<1x1x128xf32>
    %c0_6 = arith.constant 0 : index
    %c0_7 = arith.constant 0 : index
    %c0_8 = arith.constant 0 : index
    %6 = vector.load %arg4[%c0_6, %c0_7, %c0_8] : memref<1x1x128xf32, #tpu.memory_space<vmem>>, vector<1x1x128xf32>
    tpu.vector_store %arg4[%c0_6, %c0_7, %c0_8], %5 {strides = array<i32>} : memref<1x1x128xf32, #tpu.memory_space<vmem>>, vector<1x1x128xf32>,
    %7 = arith.mulf %2, %2 : vector<512x128xf32>
    %cst_9 = arith.constant dense<0.000000e+00> : vector<128xf32>
    %8 = vector.multi_reduction <add>, %7, %cst_9 [0] : vector<512x128xf32> to vector<128xf32>
    %9 = vector.shape_cast %8 : vector<128xf32> to vector<1x1x128xf32>
    %c0_10 = arith.constant 0 : index
    %c0_11 = arith.constant 0 : index
    %c0_12 = arith.constant 0 : index
    %10 = vector.load %arg5[%c0_10, %c0_11, %c0_12] : memref<1x1x128xf32, #tpu.memory_space<vmem>>, vector<1x1x128xf32>
    tpu.vector_store %arg5[%c0_10, %c0_11, %c0_12], %9 {strides = array<i32>} : memref<1x1x128xf32, #tpu.memory_space<vmem>>, vector<1x1x128xf32>,
    return
  }
  func.func @transform_0(%arg0: i32) -> (i32, i32) {
    %c0_i32 = arith.constant 0 : i32
    %c0_i32_0 = arith.constant 0 : i32
    return %arg0, %c0_i32 : i32, i32
  }
  func.func @transform_1(%arg0: i32) -> (i32, i32) {
    %c0_i32 = arith.constant 0 : i32
    %c0_i32_0 = arith.constant 0 : i32
    %c0_i32_1 = arith.constant 0 : i32
    return %c0_i32, %c0_i32_0 : i32, i32
  }
  func.func @transform_2(%arg0: i32) -> (i32, i32) {
    %c0_i32 = arith.constant 0 : i32
    %c0_i32_0 = arith.constant 0 : i32
    return %arg0, %c0_i32 : i32, i32
  }
  func.func @transform_3(%arg0: i32) -> (i32, i32, i32) {
    %c0_i32 = arith.constant 0 : i32
    %c0_i32_0 = arith.constant 0 : i32
    %c0_i32_1 = arith.constant 0 : i32
    return %arg0, %c0_i32, %c0_i32_0 : i32, i32, i32
  }
  func.func @transform_4(%arg0: i32) -> (i32, i32, i32) {
    %c0_i32 = arith.constant 0 : i32
    %c0_i32_0 = arith.constant 0 : i32
    %c0_i32_1 = arith.constant 0 : i32
    return %arg0, %c0_i32, %c0_i32_0 : i32, i32, i32
  }
}

</mosaic_0001>

<bundles_post_ra>
// kernel: tpu_custom_call.1
= control target key start
LH: loop header
LB: loop body
LE: loop exit
PB: predicated region body
PF: predicated region fallthrough
CT: control target
= control target key end

     0   :  { %10 = vsyncpa [#allocation3], 0  ;;  %s1611_s0 = inlined_call_operand.hbm [shape: bf16[512,128], index: 0, kind: input, shape index: {}]   ;;  %s1612_s1 = inlined_call_operand.hbm [shape: bf16[128,128], index: 1, kind: input, shape index: {}]   ;;  %s1613_s2 = inlined_call_operand.hbm [shape: f32[512,128], index: 2, kind: output, shape index: {0}]   ;;  %s1614_s3 = inlined_call_operand.hbm [shape: f32[1,1,128], index: 3, kind: output, shape index: {1}]   ;;  %s1615_s4 = inlined_call_operand.hbm [shape: f32[1,1,128], index: 4, kind: output, shape index: {2}]  }
   0x1   :  { %11 = vsyncpa [#allocation6], 0 }
   0x2   :  { %12 = vsyncpa [#allocation4], 0 }
   0x3   :  { %13 = vsyncpa [#allocation9], 0  ;;  %s1310_s15 = smov [#allocation2]   ;;  %s1192_s19 = scalar_lea.hbm %s1611_s0, 4096 }
   0x4   :  { %s19_s16 = sshll.u32 %s1310_s15, 4  ;;  %p1193_p0 = scmp.ne.s32.totalorder %s1611_s0, %s1192_s19  ;;  %s20_s16 = int_to_ptr.vmem [resolvable:$true] %s19_s16 }
   0x5   :  { %p1196_p1 = scmp.lt.u32.totalorder %s1192_s19, %s1611_s0 }
   0x7   :  { %p1198_p2 = pnand %p1196_p1, %p1193_p0 }
   0x9   :  { %1201 = shalt.err (!%p1198_p2)
}
   0xa   :  { %s1202_s24 = scalar_lea.vmem %s20_s16, 4096  ;;  %p1207_p4 = scmp.lt.s32.totalorder %s20_s16, %s20_s16 }
   0xb   :  { %p1203_p3 = scmp.ne.s32.totalorder %s20_s16, %s1202_s24  ;;  %p1208_p5 = scmp.lt.s32.totalorder %s1202_s24, %s1202_s24 }
   0xd   :  { %p1209_p6 = por %p1208_p5, %p1207_p4 }
   0xf   :  { %p1210_p7 = pnand %p1209_p6, %p1203_p3 }
  0x11   :  { %1213 = shalt.err (!%p1210_p7)
}
  0x12   :  { %s1311_s25 = smov 64   ;;  %s1312_s26 = smov 4  }
  0x13   :  { %25 = dma.hbm_to_vmem [thread:$0]  %s1611_s0, 4096, %s20_s16, [#allocation3], %s1311_s25, %s1311_s25, %s1312_s26  }
  0x14   :  { %s1313_s29 = smov [#allocation5]   ;;  %s1214_s7 = scalar_lea.hbm %s1612_s1, 1024 }
  0x15   :  { %s31_s30 = sshll.u32 %s1313_s29, 4  ;;  %p1215_p8 = scmp.ne.s32.totalorder %s1612_s1, %s1214_s7  ;;  %s32_s30 = int_to_ptr.vmem [resolvable:$true] %s31_s30 }
  0x16   :  { %p1218_p9 = scmp.lt.u32.totalorder %s1214_s7, %s1612_s1 }
  0x18   :  { %p1220_p10 = pnand %p1218_p9, %p1215_p8 }
  0x1a   :  { %1223 = shalt.err (!%p1220_p10)
}
  0x1b   :  { %s1224_s12 = scalar_lea.vmem %s32_s30, 1024  ;;  %p1229_p12 = scmp.lt.s32.totalorder %s32_s30, %s32_s30 }
  0x1c   :  { %p1225_p11 = scmp.ne.s32.totalorder %s32_s30, %s1224_s12  ;;  %p1230_p13 = scmp.lt.s32.totalorder %s1224_s12, %s1224_s12 }
  0x1e   :  { %p1231_p0 = por %p1230_p13, %p1229_p12 }
  0x20   :  { %p1232_p1 = pnand %p1231_p0, %p1225_p11 }
  0x22   :  { %1235 = shalt.err (!%p1232_p1)
}
  0x23   :  { %37 = dma.hbm_to_vmem [thread:$0]  %s1612_s1, 1024, %s32_s30, [#allocation6], %s1311_s25, %s1311_s25, %s1312_s26  }
  0x24   :  { %1302 = dma.done.wait [#allocation3], 4096  }
  0x25   :  { %1303 = vsyncadd [#allocation3], 4294963200 }
  0x26   :  { %1304 = dma.done.wait [#allocation6], 1024  }
  0x27   :  { %1305 = vsyncadd [#allocation6], 4294966272  ;;  %v1152_v0 = vld [vmem:[#allocation5] sm:$0xff]   ;;  %v1153_v1 = vld [vmem:[#allocation5 + $0x8] sm:$0xff]   ;;  %s1314_s1 = smov [#allocation7]  }
  0x28   :  { %1047 = vmatprep.subr.bf16.mxu0 %v1152_v0  ;;  %1127 = vmatprep.subr.bf16.mxu1 %v1152_v0  ;;  %v1154_v2 = vld [vmem:[#allocation5 + $0x10] sm:$0xff]   ;;  %v1155_v3 = vld [vmem:[#allocation5 + $0x18] sm:$0xff]   ;;  %v1160_v4 = vld [vmem:[#allocation2] sm:$0xff]   ;;  %s927_s14 = sshll.u32 %s1314_s1, 4  ;;  %s1457_s14 = int_to_ptr.vmem [resolvable:$true] %s927_s14 }
  0x29   :  { %1048 = vmatpush3.bf16.msra.mxu0 %v1152_v0  ;;  %1135 = vmatpush3.bf16.msra.mxu1 %v1152_v0  ;;  %v1156_v5 = vld [vmem:[#allocation5 + $0x20] sm:$0xff]   ;;  %v1157_v6 = vld [vmem:[#allocation5 + $0x28] sm:$0xff]   ;;  %v1158_v7 = vld [vmem:[#allocation5 + $0x30] sm:$0xff]   ;;  %s1236_s15 = scalar_lea.vmem %s1457_s14, 8192  ;;  %p1241_p3 = scmp.lt.s32.totalorder %s1457_s14, %s1457_s14 }
  0x2a   :  { %1049 = vmatprep.subr.bf16.mxu0 %v1153_v1  ;;  %1128 = vmatprep.subr.bf16.mxu1 %v1153_v1  ;;  %v1159_v8 = vld [vmem:[#allocation5 + $0x38] sm:$0xff]   ;;  %v1176_v9 = vld [vmem:[#allocation2 + $0x80] sm:$0xff]   ;;  %v1161_v10 = vld [vmem:[#allocation2 + $0x8] sm:$0xff]   ;;  %p1237_p2 = scmp.ne.s32.totalorder %s1457_s14, %s1236_s15  ;;  %p1242_p4 = scmp.lt.s32.totalorder %s1236_s15, %s1236_s15 }
  0x2b   :  { %1063 = vmatprep.mubr.bf16.mxu0 %v1160_v4  ;;  %1095 = vmatprep.mubr.bf16.mxu1 %v1176_v9  ;;  %v1162_v11 = vld [vmem:[#allocation2 + $0x10] sm:$0xff]   ;;  %v1177_v12 = vld [vmem:[#allocation2 + $0x88] sm:$0xff]   ;;  %v1163_v14 = vld [vmem:[#allocation2 + $0x18] sm:$0xff]  }
  0x2c   :  { %v1178_v13 = vld [vmem:[#allocation2 + $0x90] sm:$0xff]   ;;  %v1164_v15 = vld [vmem:[#allocation2 + $0x20] sm:$0xff]   ;;  %v1179_v16 = vld [vmem:[#allocation2 + $0x98] sm:$0xff]   ;;  %p1243_p5 = por %p1242_p4, %p1241_p3 }
  0x2d   :  { %1050 = vmatpush3.bf16.msra.mxu0 %v1153_v1  ;;  %1136 = vmatpush3.bf16.msra.mxu1 %v1153_v1  ;;  %v1180_v17 = vld [vmem:[#allocation2 + $0xa0] sm:$0xff]   ;;  %v1165_v18 = vld [vmem:[#allocation2 + $0x28] sm:$0xff]   ;;  %v1166_v20 = vld [vmem:[#allocation2 + $0x30] sm:$0xff]  }
  0x2e   :  { %1051 = vmatprep.subr.bf16.mxu0 %v1154_v2  ;;  %1129 = vmatprep.subr.bf16.mxu1 %v1154_v2  ;;  %v1181_v19 = vld [vmem:[#allocation2 + $0xa8] sm:$0xff]   ;;  %v1182_v21 = vld [vmem:[#allocation2 + $0xb0] sm:$0xff]   ;;  %v1167_v22 = vld [vmem:[#allocation2 + $0x38] sm:$0xff]   ;;  %p1244_p6 = pnand %p1243_p5, %p1237_p2 }
  0x2f   :  { %v1183_v23 = vld [vmem:[#allocation2 + $0xb8] sm:$0xff]   ;;  %v1168_v24 = vld [vmem:[#allocation2 + $0x40] sm:$0xff]   ;;  %v1169_v26 = vld [vmem:[#allocation2 + $0x48] sm:$0xff]  }
  0x30   :  { %v1184_v25 = vld [vmem:[#allocation2 + $0xc0] sm:$0xff]   ;;  %v1185_v27 = vld [vmem:[#allocation2 + $0xc8] sm:$0xff]   ;;  %v1170_v28 = vld [vmem:[#allocation2 + $0x50] sm:$0xff]  }
  0x31   :  { %1052 = vmatpush3.bf16.msra.mxu0 %v1154_v2  ;;  %1137 = vmatpush3.bf16.msra.mxu1 %v1154_v2  ;;  %v1186_v29 = vld [vmem:[#allocation2 + $0xd0] sm:$0xff]   ;;  %v1171_v30 = vld [vmem:[#allocation2 + $0x58] sm:$0xff]   ;;  %v1172_v32 = vld [vmem:[#allocation2 + $0x60] sm:$0xff]  }
  0x32   :  { %1053 = vmatprep.subr.bf16.mxu0 %v1155_v3  ;;  %1130 = vmatprep.subr.bf16.mxu1 %v1155_v3  ;;  %v1187_v31 = vld [vmem:[#allocation2 + $0xd8] sm:$0xff]   ;;  %v1188_v33 = vld [vmem:[#allocation2 + $0xe0] sm:$0xff]   ;;  %v1173_v34 = vld [vmem:[#allocation2 + $0x68] sm:$0xff]  }
  0x33   :  { %v1189_v35 = vld [vmem:[#allocation2 + $0xe8] sm:$0xff]   ;;  %v1174_v36 = vld [vmem:[#allocation2 + $0x70] sm:$0xff]   ;;  %v1175_v38 = vld [vmem:[#allocation2 + $0x78] sm:$0xff]  }
  0x34   :  { %v1190_v37 = vld [vmem:[#allocation2 + $0xf0] sm:$0xff]   ;;  %v1191_v39 = vld [vmem:[#allocation2 + $0xf8] sm:$0xff]  }
  0x35   :  { %1054 = vmatpush3.bf16.msra.mxu0 %v1155_v3  ;;  %1138 = vmatpush3.bf16.msra.mxu1 %v1155_v3 }
  0x36   :  { %1055 = vmatprep.subr.bf16.mxu0 %v1156_v5  ;;  %1131 = vmatprep.subr.bf16.mxu1 %v1156_v5 }
  0x39   :  { %1056 = vmatpush3.bf16.msra.mxu0 %v1156_v5  ;;  %1139 = vmatpush3.bf16.msra.mxu1 %v1156_v5 }
  0x3a   :  { %1057 = vmatprep.subr.bf16.mxu0 %v1157_v6  ;;  %1132 = vmatprep.subr.bf16.mxu1 %v1157_v6 }
  0x3d   :  { %1058 = vmatpush3.bf16.msra.mxu0 %v1157_v6  ;;  %1140 = vmatpush3.bf16.msra.mxu1 %v1157_v6 }
  0x3e   :  { %1059 = vmatprep.subr.bf16.mxu0 %v1158_v7  ;;  %1133 = vmatprep.subr.bf16.mxu1 %v1158_v7 }
  0x41   :  { %1060 = vmatpush3.bf16.msra.mxu0 %v1158_v7  ;;  %1141 = vmatpush3.bf16.msra.mxu1 %v1158_v7 }
  0x42   :  { %1061 = vmatprep.subr.bf16.mxu0 %v1159_v8  ;;  %1134 = vmatprep.subr.bf16.mxu1 %v1159_v8 }
  0x45   :  { %1062 = vmatpush3.bf16.msra.mxu0 %v1159_v8  ;;  %1142 = vmatpush3.bf16.msra.mxu1 %v1159_v8 }
  0x48   :  { %1064 = vmatmul.mubr.bf16.vlgmr.msra.gmra.mrb[0].mxu0 %v1161_v10  ;;  %1096 = vmatmul.mubr.bf16.vlgmr.msra.gmra.mrb[0].mxu1 %v1177_v12 }
  0x49   :  { %1067 = vmatprep.mubr.bf16.mxu0 %v1162_v11  ;;  %1099 = vmatprep.mubr.bf16.mxu1 %v1178_v13 }
  0x50   :  { %1068 = vmatmul.mubr.bf16.gmra.mrb[4].mxu0 %v1163_v14  ;;  %1100 = vmatmul.mubr.bf16.gmra.mrb[4].mxu1 %v1179_v16 }
  0x51   :  { %1071 = vmatprep.mubr.bf16.mxu0 %v1164_v15  ;;  %1103 = vmatprep.mubr.bf16.mxu1 %v1180_v17 }
  0x58   :  { %1072 = vmatmul.mubr.bf16.gmra.mrb[8].mxu0 %v1165_v18  ;;  %1104 = vmatmul.mubr.bf16.gmra.mrb[8].mxu1 %v1181_v19 }
  0x59   :  { %1075 = vmatprep.mubr.bf16.mxu0 %v1166_v20  ;;  %1107 = vmatprep.mubr.bf16.mxu1 %v1182_v21 }
  0x60   :  { %1076 = vmatmul.mubr.bf16.gmra.mrb[12].mxu0 %v1167_v22  ;;  %1108 = vmatmul.mubr.bf16.gmra.mrb[12].mxu1 %v1183_v23 }
  0x61   :  { %1079 = vmatprep.mubr.bf16.mxu0 %v1168_v24  ;;  %1111 = vmatprep.mubr.bf16.mxu1 %v1184_v25 }
  0x68   :  { %1080 = vmatmul.mubr.bf16.gmra.mrb[16].mxu0 %v1169_v26  ;;  %1112 = vmatmul.mubr.bf16.gmra.mrb[16].mxu1 %v1185_v27 }
  0x69   :  { %1083 = vmatprep.mubr.bf16.mxu0 %v1170_v28  ;;  %1115 = vmatprep.mubr.bf16.mxu1 %v1186_v29 }
  0x70   :  { %1084 = vmatmul.mubr.bf16.gmra.mrb[20].mxu0 %v1171_v30  ;;  %1116 = vmatmul.mubr.bf16.gmra.mrb[20].mxu1 %v1187_v31 }
  0x71   :  { %1087 = vmatprep.mubr.bf16.mxu0 %v1172_v32  ;;  %1119 = vmatprep.mubr.bf16.mxu1 %v1188_v33 }
  0x78   :  { %1088 = vmatmul.mubr.bf16.gmra.mrb[24].mxu0 %v1173_v34  ;;  %1120 = vmatmul.mubr.bf16.gmra.mrb[24].mxu1 %v1189_v35 }
  0x79   :  { %1091 = vmatprep.mubr.bf16.mxu0 %v1174_v36  ;;  %1123 = vmatprep.mubr.bf16.mxu1 %v1190_v37 }
  0x80   :  { %1092 = vmatmul.mubr.bf16.gmra.mrb[28].mxu0 %v1175_v38  ;;  %1124 = vmatmul.mubr.bf16.gmra.mrb[28].mxu1 %v1191_v39 }
 0x11b   :  { %v1065_v40 = vpop.f32.mrb[0].mxu0  ;;  %v1368_v41 = vpop.f32.mrb[0].mxu1 }
 0x11c   :  { %656 = vst [vmem:[#allocation7 + $0x10] sm:$0xff] %v1065_v40  ;;  %v399_v42 = vpop.f32.mrb[1].mxu0  ;;  %688 = vst [vmem:[#allocation7 + $0x110] sm:$0xff] %v1368_v41  ;;  %v1371_v43 = vpop.f32.mrb[1].mxu1  ;;  %v790_v51 = vmul.f32 %v1065_v40, %v1065_v40 }
 0x11d   :  { %654 = vst [vmem:[#allocation7] sm:$0xff] %v399_v42  ;;  %v1066_v44 = vpop.f32.mrb[2].mxu0  ;;  %686 = vst [vmem:[#allocation7 + $0x100] sm:$0xff] %v1371_v43  ;;  %v1374_v45 = vpop.f32.mrb[2].mxu1  ;;  %v788_v48 = vmul.f32 %v399_v42, %v399_v42 }
 0x11e   :  { %657 = vst [vmem:[#allocation7 + $0x18] sm:$0xff] %v1066_v44  ;;  %v402_v46 = vpop.f32.mrb[3].mxu0  ;;  %689 = vst [vmem:[#allocation7 + $0x118] sm:$0xff] %v1374_v45  ;;  %v1377_v47 = vpop.f32.mrb[3].mxu1  ;;  %v791_v54 = vmul.f32 %v1066_v44, %v1066_v44 }
 0x11f   :  { %655 = vst [vmem:[#allocation7 + $0x8] sm:$0xff] %v402_v46  ;;  %v718_v49 = vadd.f32 %v402_v46, %v399_v42  ;;  %v789_v50 = vmul.f32 %v402_v46, %v402_v46  ;;  %687 = vst [vmem:[#allocation7 + $0x108] sm:$0xff] %v1377_v47 }
 0x121   :  { %v719_v52 = vadd.f32 %v1065_v40, %v718_v49  ;;  %v852_v53 = vadd.f32 %v789_v50, %v788_v48 }
 0x123   :  { %v853_v55 = vadd.f32 %v852_v53, %v790_v51  ;;  %v1069_v56 = vpop.f32.mrb[4].mxu0  ;;  %v720_v57 = vadd.f32 %v1066_v44, %v719_v52  ;;  %v1380_v58 = vpop.f32.mrb[4].mxu1 }
 0x124   :  { %660 = vst [vmem:[#allocation7 + $0x30] sm:$0xff] %v1069_v56  ;;  %v415_v59 = vpop.f32.mrb[5].mxu0  ;;  %692 = vst [vmem:[#allocation7 + $0x130] sm:$0xff] %v1380_v58  ;;  %v1383_v60 = vpop.f32.mrb[5].mxu1  ;;  %v794_v7 = vmul.f32 %v1069_v56, %v1069_v56 }
 0x125   :  { %658 = vst [vmem:[#allocation7 + $0x20] sm:$0xff] %v415_v59  ;;  %v721_v61 = vadd.f32 %v720_v57, %v415_v59  ;;  %v792_v62 = vmul.f32 %v415_v59, %v415_v59  ;;  %v854_v63 = vadd.f32 %v853_v55, %v791_v54  ;;  %v1070_v0 = vpop.f32.mrb[6].mxu0  ;;  %690 = vst [vmem:[#allocation7 + $0x120] sm:$0xff] %v1383_v60  ;;  %v1386_v1 = vpop.f32.mrb[6].mxu1 }
 0x126   :  { %661 = vst [vmem:[#allocation7 + $0x38] sm:$0xff] %v1070_v0  ;;  %v418_v2 = vpop.f32.mrb[7].mxu0  ;;  %693 = vst [vmem:[#allocation7 + $0x138] sm:$0xff] %v1386_v1  ;;  %v1389_v3 = vpop.f32.mrb[7].mxu1  ;;  %v795_v10 = vmul.f32 %v1070_v0, %v1070_v0 }
 0x127   :  { %v855_v4 = vadd.f32 %v854_v63, %v792_v62  ;;  %659 = vst [vmem:[#allocation7 + $0x28] sm:$0xff] %v418_v2  ;;  %v722_v5 = vadd.f32 %v721_v61, %v418_v2  ;;  %v793_v6 = vmul.f32 %v418_v2, %v418_v2  ;;  %691 = vst [vmem:[#allocation7 + $0x128] sm:$0xff] %v1389_v3 }
 0x129   :  { %v723_v8 = vadd.f32 %v1069_v56, %v722_v5  ;;  %v856_v9 = vadd.f32 %v855_v4, %v793_v6 }
 0x12b   :  { %v857_v11 = vadd.f32 %v856_v9, %v794_v7  ;;  %v1073_v12 = vpop.f32.mrb[8].mxu0  ;;  %v724_v13 = vadd.f32 %v1070_v0, %v723_v8  ;;  %v1392_v14 = vpop.f32.mrb[8].mxu1 }
 0x12c   :  { %664 = vst [vmem:[#allocation7 + $0x50] sm:$0xff] %v1073_v12  ;;  %v431_v15 = vpop.f32.mrb[9].mxu0  ;;  %696 = vst [vmem:[#allocation7 + $0x150] sm:$0xff] %v1392_v14  ;;  %v1395_v16 = vpop.f32.mrb[9].mxu1  ;;  %v798_v27 = vmul.f32 %v1073_v12, %v1073_v12 }
 0x12d   :  { %662 = vst [vmem:[#allocation7 + $0x40] sm:$0xff] %v431_v15  ;;  %v725_v17 = vadd.f32 %v724_v13, %v431_v15  ;;  %v796_v18 = vmul.f32 %v431_v15, %v431_v15  ;;  %v858_v19 = vadd.f32 %v857_v11, %v795_v10  ;;  %v1074_v20 = vpop.f32.mrb[10].mxu0  ;;  %694 = vst [vmem:[#allocation7 + $0x140] sm:$0xff] %v1395_v16  ;;  %v1398_v21 = vpop.f32.mrb[10].mxu1 }
 0x12e   :  { %665 = vst [vmem:[#allocation7 + $0x58] sm:$0xff] %v1074_v20  ;;  %v434_v22 = vpop.f32.mrb[11].mxu0  ;;  %697 = vst [vmem:[#allocation7 + $0x158] sm:$0xff] %v1398_v21  ;;  %v1401_v23 = vpop.f32.mrb[11].mxu1  ;;  %v799_v30 = vmul.f32 %v1074_v20, %v1074_v20 }
 0x12f   :  { %v859_v24 = vadd.f32 %v858_v19, %v796_v18  ;;  %663 = vst [vmem:[#allocation7 + $0x48] sm:$0xff] %v434_v22  ;;  %v726_v25 = vadd.f32 %v725_v17, %v434_v22  ;;  %v797_v26 = vmul.f32 %v434_v22, %v434_v22  ;;  %695 = vst [vmem:[#allocation7 + $0x148] sm:$0xff] %v1401_v23 }
 0x131   :  { %v727_v28 = vadd.f32 %v1073_v12, %v726_v25  ;;  %v860_v29 = vadd.f32 %v859_v24, %v797_v26 }
 0x133   :  { %v861_v31 = vadd.f32 %v860_v29, %v798_v27  ;;  %v1077_v32 = vpop.f32.mrb[12].mxu0  ;;  %v728_v33 = vadd.f32 %v1074_v20, %v727_v28  ;;  %v1404_v34 = vpop.f32.mrb[12].mxu1 }
 0x134   :  { %668 = vst [vmem:[#allocation7 + $0x70] sm:$0xff] %v1077_v32  ;;  %v447_v35 = vpop.f32.mrb[13].mxu0  ;;  %700 = vst [vmem:[#allocation7 + $0x170] sm:$0xff] %v1404_v34  ;;  %v1407_v36 = vpop.f32.mrb[13].mxu1  ;;  %v802_v51 = vmul.f32 %v1077_v32, %v1077_v32 }
 0x135   :  { %666 = vst [vmem:[#allocation7 + $0x60] sm:$0xff] %v447_v35  ;;  %v729_v37 = vadd.f32 %v728_v33, %v447_v35  ;;  %v800_v38 = vmul.f32 %v447_v35, %v447_v35  ;;  %v862_v39 = vadd.f32 %v861_v31, %v799_v30  ;;  %v1078_v40 = vpop.f32.mrb[14].mxu0  ;;  %698 = vst [vmem:[#allocation7 + $0x160] sm:$0xff] %v1407_v36  ;;  %v1410_v42 = vpop.f32.mrb[14].mxu1 }
 0x136   :  { %669 = vst [vmem:[#allocation7 + $0x78] sm:$0xff] %v1078_v40  ;;  %v450_v44 = vpop.f32.mrb[15].mxu0  ;;  %701 = vst [vmem:[#allocation7 + $0x178] sm:$0xff] %v1410_v42  ;;  %v1413_v46 = vpop.f32.mrb[15].mxu1  ;;  %v803_v54 = vmul.f32 %v1078_v40, %v1078_v40 }
 0x137   :  { %v863_v48 = vadd.f32 %v862_v39, %v800_v38  ;;  %667 = vst [vmem:[#allocation7 + $0x68] sm:$0xff] %v450_v44  ;;  %v730_v49 = vadd.f32 %v729_v37, %v450_v44  ;;  %v801_v50 = vmul.f32 %v450_v44, %v450_v44  ;;  %699 = vst [vmem:[#allocation7 + $0x168] sm:$0xff] %v1413_v46 }
 0x139   :  { %v731_v52 = vadd.f32 %v1077_v32, %v730_v49  ;;  %v864_v53 = vadd.f32 %v863_v48, %v801_v50 }
 0x13b   :  { %v865_v55 = vadd.f32 %v864_v53, %v802_v51  ;;  %v1081_v56 = vpop.f32.mrb[16].mxu0  ;;  %v732_v57 = vadd.f32 %v1078_v40, %v731_v52  ;;  %v1416_v59 = vpop.f32.mrb[16].mxu1 }
 0x13c   :  { %672 = vst [vmem:[#allocation7 + $0x90] sm:$0xff] %v1081_v56  ;;  %v463_v61 = vpop.f32.mrb[17].mxu0  ;;  %704 = vst [vmem:[#allocation7 + $0x190] sm:$0xff] %v1416_v59  ;;  %v1419_v62 = vpop.f32.mrb[17].mxu1  ;;  %v806_v11 = vmul.f32 %v1081_v56, %v1081_v56 }
 0x13d   :  { %670 = vst [vmem:[#allocation7 + $0x80] sm:$0xff] %v463_v61  ;;  %v733_v63 = vadd.f32 %v732_v57, %v463_v61  ;;  %v804_v0 = vmul.f32 %v463_v61, %v463_v61  ;;  %v866_v2 = vadd.f32 %v865_v55, %v803_v54  ;;  %v1082_v4 = vpop.f32.mrb[18].mxu0  ;;  %702 = vst [vmem:[#allocation7 + $0x180] sm:$0xff] %v1419_v62  ;;  %v1422_v5 = vpop.f32.mrb[18].mxu1 }
 0x13e   :  { %673 = vst [vmem:[#allocation7 + $0x98] sm:$0xff] %v1082_v4  ;;  %v466_v6 = vpop.f32.mrb[19].mxu0  ;;  %705 = vst [vmem:[#allocation7 + $0x198] sm:$0xff] %v1422_v5  ;;  %v1425_v7 = vpop.f32.mrb[19].mxu1  ;;  %v807_v15 = vmul.f32 %v1082_v4, %v1082_v4 }
 0x13f   :  { %v867_v8 = vadd.f32 %v866_v2, %v804_v0  ;;  %671 = vst [vmem:[#allocation7 + $0x88] sm:$0xff] %v466_v6  ;;  %v734_v9 = vadd.f32 %v733_v63, %v466_v6  ;;  %v805_v10 = vmul.f32 %v466_v6, %v466_v6  ;;  %703 = vst [vmem:[#allocation7 + $0x188] sm:$0xff] %v1425_v7 }
 0x141   :  { %v735_v12 = vadd.f32 %v1081_v56, %v734_v9  ;;  %v868_v13 = vadd.f32 %v867_v8, %v805_v10 }
 0x143   :  { %v869_v17 = vadd.f32 %v868_v13, %v806_v11  ;;  %v1085_v18 = vpop.f32.mrb[20].mxu0  ;;  %v736_v19 = vadd.f32 %v1082_v4, %v735_v12  ;;  %v1428_v20 = vpop.f32.mrb[20].mxu1 }
 0x144   :  { %676 = vst [vmem:[#allocation7 + $0xb0] sm:$0xff] %v1085_v18  ;;  %v479_v22 = vpop.f32.mrb[21].mxu0  ;;  %708 = vst [vmem:[#allocation7 + $0x1b0] sm:$0xff] %v1428_v20  ;;  %v1431_v24 = vpop.f32.mrb[21].mxu1  ;;  %v810_v37 = vmul.f32 %v1085_v18, %v1085_v18 }
 0x145   :  { %674 = vst [vmem:[#allocation7 + $0xa0] sm:$0xff] %v479_v22  ;;  %v737_v25 = vadd.f32 %v736_v19, %v479_v22  ;;  %v808_v26 = vmul.f32 %v479_v22, %v479_v22  ;;  %v870_v27 = vadd.f32 %v869_v17, %v807_v15  ;;  %v1086_v28 = vpop.f32.mrb[22].mxu0  ;;  %706 = vst [vmem:[#allocation7 + $0x1a0] sm:$0xff] %v1431_v24  ;;  %v1434_v29 = vpop.f32.mrb[22].mxu1 }
 0x146   :  { %677 = vst [vmem:[#allocation7 + $0xb8] sm:$0xff] %v1086_v28  ;;  %v482_v30 = vpop.f32.mrb[23].mxu0  ;;  %709 = vst [vmem:[#allocation7 + $0x1b8] sm:$0xff] %v1434_v29  ;;  %v1437_v31 = vpop.f32.mrb[23].mxu1  ;;  %v811_v40 = vmul.f32 %v1086_v28, %v1086_v28 }
 0x147   :  { %v871_v32 = vadd.f32 %v870_v27, %v808_v26  ;;  %675 = vst [vmem:[#allocation7 + $0xa8] sm:$0xff] %v482_v30  ;;  %v738_v33 = vadd.f32 %v737_v25, %v482_v30  ;;  %v809_v35 = vmul.f32 %v482_v30, %v482_v30  ;;  %707 = vst [vmem:[#allocation7 + $0x1a8] sm:$0xff] %v1437_v31 }
 0x149   :  { %v739_v38 = vadd.f32 %v1085_v18, %v738_v33  ;;  %v872_v39 = vadd.f32 %v871_v32, %v809_v35 }
 0x14b   :  { %v873_v44 = vadd.f32 %v872_v39, %v810_v37  ;;  %v1089_v48 = vpop.f32.mrb[24].mxu0  ;;  %v740_v49 = vadd.f32 %v1086_v28, %v739_v38  ;;  %v1440_v50 = vpop.f32.mrb[24].mxu1 }
 0x14c   :  { %680 = vst [vmem:[#allocation7 + $0xd0] sm:$0xff] %v1089_v48  ;;  %v495_v51 = vpop.f32.mrb[25].mxu0  ;;  %712 = vst [vmem:[#allocation7 + $0x1d0] sm:$0xff] %v1440_v50  ;;  %v1443_v52 = vpop.f32.mrb[25].mxu1  ;;  %v814_v6 = vmul.f32 %v1089_v48, %v1089_v48 }
 0x14d   :  { %678 = vst [vmem:[#allocation7 + $0xc0] sm:$0xff] %v495_v51  ;;  %v741_v53 = vadd.f32 %v740_v49, %v495_v51  ;;  %v812_v54 = vmul.f32 %v495_v51, %v495_v51  ;;  %v874_v55 = vadd.f32 %v873_v44, %v811_v40  ;;  %v1090_v56 = vpop.f32.mrb[26].mxu0  ;;  %710 = vst [vmem:[#allocation7 + $0x1c0] sm:$0xff] %v1443_v52  ;;  %v1446_v57 = vpop.f32.mrb[26].mxu1 }
 0x14e   :  { %681 = vst [vmem:[#allocation7 + $0xd8] sm:$0xff] %v1090_v56  ;;  %v498_v61 = vpop.f32.mrb[27].mxu0  ;;  %713 = vst [vmem:[#allocation7 + $0x1d8] sm:$0xff] %v1446_v57  ;;  %v1449_v63 = vpop.f32.mrb[27].mxu1  ;;  %v815_v10 = vmul.f32 %v1090_v56, %v1090_v56 }
 0x14f   :  { %v875_v0 = vadd.f32 %v874_v55, %v812_v54  ;;  %679 = vst [vmem:[#allocation7 + $0xc8] sm:$0xff] %v498_v61  ;;  %v742_v2 = vadd.f32 %v741_v53, %v498_v61  ;;  %v813_v4 = vmul.f32 %v498_v61, %v498_v61  ;;  %711 = vst [vmem:[#allocation7 + $0x1c8] sm:$0xff] %v1449_v63 }
 0x151   :  { %v743_v8 = vadd.f32 %v1089_v48, %v742_v2  ;;  %v876_v9 = vadd.f32 %v875_v0, %v813_v4 }
 0x153   :  { %v877_v11 = vadd.f32 %v876_v9, %v814_v6  ;;  %v1093_v12 = vpop.f32.mrb[28].mxu0  ;;  %v744_v13 = vadd.f32 %v1090_v56, %v743_v8  ;;  %v1452_v15 = vpop.f32.mrb[28].mxu1 }
 0x154   :  { %684 = vst [vmem:[#allocation7 + $0xf0] sm:$0xff] %v1093_v12  ;;  %v511_v17 = vpop.f32.mrb[29].mxu0  ;;  %716 = vst [vmem:[#allocation7 + $0x1f0] sm:$0xff] %v1452_v15  ;;  %v1455_v18 = vpop.f32.mrb[29].mxu1 }
 0x155   :  { %682 = vst [vmem:[#allocation7 + $0xe0] sm:$0xff] %v511_v17  ;;  %v745_v19 = vadd.f32 %v744_v13, %v511_v17  ;;  %v816_v22 = vmul.f32 %v511_v17, %v511_v17  ;;  %v878_v25 = vadd.f32 %v877_v11, %v815_v10  ;;  %v1094_v26 = vpop.f32.mrb[30].mxu0  ;;  %714 = vst [vmem:[#allocation7 + $0x1e0] sm:$0xff] %v1455_v18  ;;  %v1460_v27 = vpop.f32.mrb[30].mxu1 }
 0x156   :  { %685 = vst [vmem:[#allocation7 + $0xf8] sm:$0xff] %v1094_v26  ;;  %v514_v28 = vpop.f32.mrb[31].mxu0  ;;  %717 = vst [vmem:[#allocation7 + $0x1f8] sm:$0xff] %v1460_v27  ;;  %v1463_v30 = vpop.f32.mrb[31].mxu1 }
 0x157   :  { %v879_v32 = vadd.f32 %v878_v25, %v816_v22  ;;  %683 = vst [vmem:[#allocation7 + $0xe8] sm:$0xff] %v514_v28  ;;  %v746_v33 = vadd.f32 %v745_v19, %v514_v28  ;;  %v817_v35 = vmul.f32 %v514_v28, %v514_v28  ;;  %715 = vst [vmem:[#allocation7 + $0x1e8] sm:$0xff] %v1463_v30 }
 0x158   :  { %1247 = shalt.err (!%p1244_p6)
}
 0x159   :  { %s1248_s18 = scalar_lea.hbm %s1613_s2, 8192 }
 0x15a   :  { %p1249_p7 = scmp.ne.s32.totalorder %s1613_s2, %s1248_s18  ;;  %p1252_p8 = scmp.lt.u32.totalorder %s1248_s18, %s1613_s2 }
 0x15c   :  { %p1254_p9 = pnand %p1252_p8, %p1249_p7 }
 0x15e   :  { %1257 = shalt.err (!%p1254_p9)
}
 0x15f   :  { %s1315_s23 = smov 128   ;;  %s1316_s24 = smov 8   ;;  %v818_v37 = vmul.f32 %v1093_v12, %v1093_v12  ;;  %v747_v38 = vadd.f32 %v1093_v12, %v746_v33  ;;  %v880_v39 = vadd.f32 %v879_v32, %v817_v35  ;;  %v819_v40 = vmul.f32 %v1094_v26, %v1094_v26 }
 0x160   :  { %933 = dma.vmem_to_hbm [thread:$0]  %s1457_s14, 8192, %s1613_s2, [#allocation4], %s1315_s23, %s1315_s23, %s1316_s24   ;;  %v820_v49 = vmul.f32 %v1371_v43, %v1371_v43  ;;  %v821_v56 = vmul.f32 %v1377_v47, %v1377_v47  ;;  %v822_v61 = vmul.f32 %v1368_v41, %v1368_v41  ;;  %v823_v4 = vmul.f32 %v1374_v45, %v1374_v45 }
 0x161   :  { %v881_v44 = vadd.f32 %v880_v39, %v818_v37  ;;  %v748_v48 = vadd.f32 %v1094_v26, %v747_v38  ;;  %v825_v12 = vmul.f32 %v1389_v3, %v1389_v3  ;;  %v829_v32 = vmul.f32 %v1401_v23, %v1401_v23  ;;  %s1317_s2 = smov [#allocation8]   ;;  %s1318_s28 = smov [#allocation10]  }
 0x162   :  { %s940_s27 = sshll.u32 %s1317_s2, 4  ;;  %s950_s29 = sshll.u32 %s1318_s28, 4  ;;  %s941_s27 = int_to_ptr.vmem [resolvable:$true] %s940_s27  ;;  %s1579_s29 = int_to_ptr.vmem [resolvable:$true] %s950_s29 }
 0x163   :  { %v749_v51 = vadd.f32 %v748_v48, %v1371_v43  ;;  %v882_v53 = vadd.f32 %v881_v44, %v819_v40  ;;  %v824_v43 = vmul.f32 %v1383_v60, %v1383_v60  ;;  %v833_v48 = vmul.f32 %v1413_v46, %v1413_v46  ;;  %s1258_s30 = scalar_lea.vmem %s941_s27, 16  ;;  %s1262_s5 = scalar_lea.vmem %s941_s27, 32 }
 0x164   :  { %p1259_p10 = scmp.ne.s32.totalorder %s941_s27, %s1258_s30  ;;  %p1263_p11 = scmp.lt.s32.totalorder %s941_s27, %s941_s27 }
 0x165   :  { %v883_v54 = vadd.f32 %v882_v53, %v820_v49  ;;  %v750_v55 = vadd.f32 %v749_v51, %v1377_v47  ;;  %p1264_p12 = scmp.lt.s32.totalorder %s1262_s5, %s1258_s30 }
 0x167   :  { %v751_v0 = vadd.f32 %v1368_v41, %v750_v55  ;;  %v884_v2 = vadd.f32 %v883_v54, %v821_v56  ;;  %v826_v41 = vmul.f32 %v1380_v58, %v1380_v58  ;;  %p1265_p13 = por %p1264_p12, %p1263_p11 }
 0x169   :  { %v885_v6 = vadd.f32 %v884_v2, %v822_v61  ;;  %v752_v8 = vadd.f32 %v1374_v45, %v751_v0  ;;  %v827_v45 = vmul.f32 %v1386_v1, %v1386_v1  ;;  %v837_v0 = vmul.f32 %v1425_v7, %v1425_v7  ;;  %p1266_p0 = pnand %p1265_p13, %p1259_p10 }
 0x16b   :  { %v753_v9 = vadd.f32 %v752_v8, %v1383_v60  ;;  %v886_v10 = vadd.f32 %v885_v6, %v823_v4  ;;  %v828_v60 = vmul.f32 %v1395_v16, %v1395_v16 }
 0x16d   :  { %v887_v11 = vadd.f32 %v886_v10, %v824_v43  ;;  %v754_v47 = vadd.f32 %v753_v9, %v1389_v3 }
 0x16f   :  { %v755_v13 = vadd.f32 %v1380_v58, %v754_v47  ;;  %v888_v17 = vadd.f32 %v887_v11, %v825_v12  ;;  %v830_v58 = vmul.f32 %v1392_v14, %v1392_v14  ;;  %v841_v11 = vmul.f32 %v1437_v31, %v1437_v31 }
 0x171   :  { %v889_v19 = vadd.f32 %v888_v17, %v826_v41  ;;  %v756_v22 = vadd.f32 %v1386_v1, %v755_v13  ;;  %v831_v1 = vmul.f32 %v1398_v21, %v1398_v21 }
 0x173   :  { %v757_v25 = vadd.f32 %v756_v22, %v1395_v16  ;;  %v890_v26 = vadd.f32 %v889_v19, %v827_v45  ;;  %v832_v16 = vmul.f32 %v1407_v36, %v1407_v36  ;;  %v845_v22 = vmul.f32 %v1449_v63, %v1449_v63 }
 0x175   :  { %v891_v28 = vadd.f32 %v890_v26, %v828_v60  ;;  %v758_v3 = vadd.f32 %v757_v25, %v1401_v23 }
 0x177   :  { %v759_v33 = vadd.f32 %v1392_v14, %v758_v3  ;;  %v892_v35 = vadd.f32 %v891_v28, %v829_v32  ;;  %v834_v14 = vmul.f32 %v1404_v34, %v1404_v34 }
 0x179   :  { %v893_v37 = vadd.f32 %v892_v35, %v830_v58  ;;  %v760_v38 = vadd.f32 %v1398_v21, %v759_v33  ;;  %v835_v21 = vmul.f32 %v1410_v42, %v1410_v42  ;;  %v849_v33 = vmul.f32 %v1463_v30, %v1463_v30 }
 0x17b   :  { %v761_v39 = vadd.f32 %v760_v38, %v1407_v36  ;;  %v894_v40 = vadd.f32 %v893_v37, %v831_v1  ;;  %v836_v36 = vmul.f32 %v1419_v62, %v1419_v62 }
 0x17d   :  { %v895_v44 = vadd.f32 %v894_v40, %v832_v16  ;;  %v762_v23 = vadd.f32 %v761_v39, %v1413_v46 }
 0x17f   :  { %v763_v49 = vadd.f32 %v1404_v34, %v762_v23  ;;  %v896_v51 = vadd.f32 %v895_v44, %v833_v48  ;;  %v838_v34 = vmul.f32 %v1416_v59, %v1416_v59 }
 0x181   :  { %v897_v53 = vadd.f32 %v896_v51, %v834_v14  ;;  %v764_v54 = vadd.f32 %v1410_v42, %v763_v49  ;;  %v839_v42 = vmul.f32 %v1422_v5, %v1422_v5 }
 0x183   :  { %v765_v55 = vadd.f32 %v764_v54, %v1419_v62  ;;  %v898_v56 = vadd.f32 %v897_v53, %v835_v21  ;;  %v840_v62 = vmul.f32 %v1431_v24, %v1431_v24 }
 0x185   :  { %v899_v61 = vadd.f32 %v898_v56, %v836_v36  ;;  %v766_v46 = vadd.f32 %v765_v55, %v1425_v7 }
 0x187   :  { %v767_v2 = vadd.f32 %v1416_v59, %v766_v46  ;;  %v900_v4 = vadd.f32 %v899_v61, %v837_v0  ;;  %v842_v59 = vmul.f32 %v1428_v20, %v1428_v20 }
 0x189   :  { %v901_v6 = vadd.f32 %v900_v4, %v838_v34  ;;  %v768_v8 = vadd.f32 %v1422_v5, %v767_v2  ;;  %v843_v5 = vmul.f32 %v1434_v29, %v1434_v29 }
 0x18b   :  { %v769_v43 = vadd.f32 %v768_v8, %v1431_v24  ;;  %v902_v9 = vadd.f32 %v901_v6, %v839_v42  ;;  %v844_v24 = vmul.f32 %v1443_v52, %v1443_v52 }
 0x18d   :  { %v903_v10 = vadd.f32 %v902_v9, %v840_v62  ;;  %v770_v7 = vadd.f32 %v769_v43, %v1437_v31 }
 0x18f   :  { %v771_v47 = vadd.f32 %v1428_v20, %v770_v7  ;;  %v904_v12 = vadd.f32 %v903_v10, %v841_v11  ;;  %v846_v20 = vmul.f32 %v1440_v50, %v1440_v50 }
 0x191   :  { %v905_v41 = vadd.f32 %v904_v12, %v842_v59  ;;  %v772_v13 = vadd.f32 %v1434_v29, %v771_v47  ;;  %v847_v29 = vmul.f32 %v1446_v57, %v1446_v57 }
 0x193   :  { %v773_v17 = vadd.f32 %v772_v13, %v1443_v52  ;;  %v906_v45 = vadd.f32 %v905_v41, %v843_v5  ;;  %v848_v52 = vmul.f32 %v1455_v18, %v1455_v18 }
 0x195   :  { %v907_v19 = vadd.f32 %v906_v45, %v844_v24  ;;  %v774_v31 = vadd.f32 %v773_v17, %v1449_v63 }
 0x197   :  { %v775_v60 = vadd.f32 %v1440_v50, %v774_v31  ;;  %v908_v25 = vadd.f32 %v907_v19, %v845_v22  ;;  %v850_v50 = vmul.f32 %v1452_v15, %v1452_v15 }
 0x199   :  { %v909_v26 = vadd.f32 %v908_v25, %v846_v20  ;;  %v776_v28 = vadd.f32 %v1446_v57, %v775_v60  ;;  %v851_v57 = vmul.f32 %v1460_v27, %v1460_v27 }
 0x19b   :  { %v777_v3 = vadd.f32 %v776_v28, %v1455_v18  ;;  %v910_v32 = vadd.f32 %v909_v26, %v847_v29 }
 0x19d   :  { %v911_v58 = vadd.f32 %v910_v32, %v848_v52  ;;  %v778_v63 = vadd.f32 %v777_v3, %v1463_v30 }
 0x19f   :  { %v779_v35 = vadd.f32 %v1452_v15, %v778_v63  ;;  %v912_v1 = vadd.f32 %v911_v58, %v849_v33 }
 0x1a1   :  { %v780_v37 = vadd.f32 %v1460_v27, %v779_v35  ;;  %v913_v38 = vadd.f32 %v912_v1, %v850_v50 }
 0x1a3   :  { %v781_v18 = vrot.slane %v780_v37, 4  ;;  %v914_v16 = vadd.f32 %v913_v38, %v851_v57 }
 0x1a5   :  { %v915_v39 = vrot.slane %v914_v16, 4  ;;  %v782_v40 = vadd.f32 %v781_v18, %v780_v37 }
 0x1a7   :  { %v783_v44 = vrot.slane %v782_v40, 2  ;;  %v916_v23 = vadd.f32 %v915_v39, %v914_v16 }
 0x1a9   :  { %v784_v48 = vadd.f32 %v783_v44, %v782_v40  ;;  %v917_v30 = vrot.slane %v916_v23, 2 }
 0x1ab   :  { %v785_v14 = vrot.slane %v784_v48, 1  ;;  %v918_v49 = vadd.f32 %v917_v30, %v916_v23 }
 0x1ad   :  { %v786_v15 = vadd.f32 %v785_v14, %v784_v48  ;;  %v919_v51 = vrot.slane %v918_v49, 1 }
 0x1af   :  { %787 = vst [vmem:[#allocation8] sm:$0x1] %v786_v15  ;;  %v920_v27 = vadd.f32 %v919_v51, %v918_v49 }
 0x1b0   :  { %1269 = shalt.err (!%p1266_p0)
}
 0x1b1   :  { %s1270_s8 = scalar_lea.hbm %s1614_s3, 16 }
 0x1b2   :  { %p1271_p1 = scmp.ne.s32.totalorder %s1614_s3, %s1270_s8  ;;  %p1274_p2 = scmp.lt.u32.totalorder %s1270_s8, %s1614_s3 }
 0x1b4   :  { %p1276_p3 = pnand %p1274_p2, %p1271_p1 }
 0x1b6   :  { %1279 = shalt.err (!%p1276_p3)
}
 0x1b7   :  { %943 = dma.vmem_to_hbm [thread:$0]  %s941_s27, 16, %s1614_s3, [#allocation9]   ;;  %921 = vst [vmem:[#allocation10] sm:$0x1] %v920_v27 }
 0x1b8   :  { %s1280_s1 = scalar_lea.vmem %s1579_s29, 16  ;;  %s1284_s14 = scalar_lea.vmem %s1579_s29, 32 }
 0x1b9   :  { %p1281_p4 = scmp.ne.s32.totalorder %s1579_s29, %s1280_s1  ;;  %p1285_p5 = scmp.lt.s32.totalorder %s1579_s29, %s1579_s29 }
 0x1ba   :  { %p1286_p6 = scmp.lt.s32.totalorder %s1284_s14, %s1280_s1 }
 0x1bc   :  { %p1287_p7 = por %p1286_p6, %p1285_p5 }
 0x1be   :  { %p1288_p8 = pnand %p1287_p7, %p1281_p4 }
 0x1c0   :  { %1291 = shalt.err (!%p1288_p8)
}
 0x1c1   :  { %s1292_s17 = scalar_lea.hbm %s1615_s4, 16 }
 0x1c2   :  { %p1293_p9 = scmp.ne.s32.totalorder %s1615_s4, %s1292_s17  ;;  %p1296_p10 = scmp.lt.u32.totalorder %s1292_s17, %s1615_s4 }
 0x1c4   :  { %p1298_p11 = pnand %p1296_p10, %p1293_p9 }
 0x1c6   :  { %1301 = shalt.err (!%p1298_p11)
}
 0x1c7   :  { %953 = dma.vmem_to_hbm [thread:$0]  %s1579_s29, 16, %s1615_s4, [#allocation9]  }
 0x1c8   :  { %1306 = dma.done.wait [#allocation4], 8192  }
 0x1c9   :  { %1307 = vsyncadd [#allocation4], 4294959104 }
 0x1ca   :  { %1308 = dma.done.wait [#allocation9], 32  }
 0x1cb   :  { %1309 = vsyncadd [#allocation9], 4294967264 }
 0x1cc   :  { %963 = vsyncpa [#allocation3], 1 }
 0x1cd   :  { %964 = vsyncpa [#allocation6], 1 }
 0x1ce   :  { %965 = vsyncpa [#allocation4], 1 }
 0x1cf   :  { %966 = vsyncpa [#allocation9], 1 }

</bundles_post_ra>
